<compile_context>
chip_gen: v7x
topology: tpu7x:2x2x1
jax: 0.10.0
libtpu: 0.0.40
codegen_flags: <defaults>
</compile_context>

<pallas_src>
import jax
import jax.numpy as jnp
from jax.experimental import pallas as pl
from jax.experimental.pallas import tpu as pltpu


def _dos_loss_kernel(target_ref, slab_ref, wt_ref, logits_ref, out_ref):
    # target_ref: SMEM (1,) int32 class index
    # slab_ref:   VMEM (K+1, F): rows 0..K-1 are neighbour features n, row K is d
    # wt_ref:     VMEM (K, R)   transposed weights (w.T)
    # logits_ref: VMEM (K, C)   per-neighbour class scores
    # out_ref:    VMEM (1, 1)   scalar loss
    slab = slab_ref[...].astype(jnp.float32)            # (K+1, F)
    K = slab.shape[0] - 1
    n_mat = slab[:K, :]                                  # (K, F)
    d_row = slab[K:K + 1, :]                             # (1, F)
    w_t = wt_ref[...].astype(jnp.float32)                # (K, R)
    logits = logits_ref[...].astype(jnp.float32)         # (K, C)
    tgt = target_ref[0]

    # per-neighbour L2 norms ||d - n_k|| as a (K, 1) column (lane reduction).
    diff = n_mat - d_row                                 # (K, F) sublane broadcast of d
    sq = jnp.sum(diff * diff, axis=1, keepdims=True)     # (K, 1)
    norm_col = jnp.sqrt(sq)                              # (K, 1)

    # f_loss = sum(w @ norm_col) == sum_{k,r} w[r, k] * norm[k]
    f_mat = jnp.sum(w_t * norm_col, keepdims=True)       # (1, 1)

    # per-neighbour cross entropy: ce[k] = logsumexp(logits[k]) - logits[k, tgt]
    m = jnp.max(logits, axis=1, keepdims=True)           # (K, 1)
    lse = m + jnp.log(jnp.sum(jnp.exp(logits - m), axis=1, keepdims=True))  # (K, 1)
    col_ids = jax.lax.broadcasted_iota(jnp.int32, logits.shape, 1)          # (K, C)
    correct = jnp.sum(jnp.where(col_ids == tgt, logits, 0.0),
                      axis=1, keepdims=True)             # (K, 1)
    ce_col = lse - correct                               # (K, 1)

    # rho (stored transposed): rho_t[k, r] = exp(-w[r,k]*norm[k]) / sum_k' exp(-w[r,k']*norm[k'])
    # Like the PyTorch code, no max-subtraction (safe while w >= 0 so the exponent <= 0).
    e = jnp.exp(-w_t * norm_col)                         # (K, R)
    denom = jnp.sum(e, axis=0, keepdims=True)            # (1, R) sublane reduction
    rho_t = e * pl.reciprocal(denom, approx=True)        # (K, R)

    # g_loss = sum(rho @ ce_col) == sum_{k,r} rho_t[k, r] * ce[k]   (pure VPU, no MXU)
    g_mat = jnp.sum(rho_t * ce_col, keepdims=True)       # (1, 1)

    out_ref[...] = f_mat + g_mat


@jax.jit
def _dos_loss_pallas(d, n, w, logits, target_i32):
    # d: (F,), n: (K, F), w: (R, K), logits: (K, C), target_i32: (1,)
    K, F = n.shape
    # Pack d as one extra row of the neighbour slab -> one fewer input DMA and no
    # degenerate 1-lane-wide (F, 1) tile.
    slab = jnp.concatenate([n, d.reshape(1, F)], axis=0)   # (K+1, F)
    w_t = jnp.transpose(w)                                 # (K, R) tiny host-side op

    out = pl.pallas_call(
        _dos_loss_kernel,
        out_shape=jax.ShapeDtypeStruct((1, 1), jnp.float32),
        in_specs=[
            pl.BlockSpec(memory_space=pltpu.MemorySpace.SMEM),  # target (1,) int32
            pl.BlockSpec(memory_space=pltpu.MemorySpace.VMEM),  # slab  (K+1, F)
            pl.BlockSpec(memory_space=pltpu.MemorySpace.VMEM),  # w_t   (K, R)
            pl.BlockSpec(memory_space=pltpu.MemorySpace.VMEM),  # logits(K, C)
        ],
        out_specs=pl.BlockSpec(memory_space=pltpu.MemorySpace.VMEM),
    )(target_i32, slab, w_t, logits)
    return out[0, 0]


def dos_loss(deep_feats, cls_score, target, n, w):
    """JAX/Pallas equivalent of DOSLoss.forward.

    deep_feats: (B, F)  float32
    cls_score:  (B, K, C) float32   (cls_score[0] is used, like PyTorch)
    target:     (1,) int32 class index
    n:          (K, F) float32 neighbour deep features
    w:          (R, K) float32 weights (assumed non-negative, as in DOS)
    """
    if n.size == 0 or w.size == 0:
        # Degenerate branch (no oversampled neighbours): plain CE on the flattened
        # score, exactly `self.ce_loss(cls_score[0].view(1, -1), target)`.
        # TODO(synk): PyTorch flattens a (K, C) score to K*C classes here; this mirrors
        # that literally and only makes sense when cls_score[0] is a single score vector.
        logits = cls_score[0].reshape(1, -1).astype(jnp.float32)
        lse = jax.scipy.special.logsumexp(logits, axis=-1)
        return (lse - logits[0, target[0]])[0]

    return _dos_loss_pallas(
        deep_feats[0].astype(jnp.float32),
        n.astype(jnp.float32),
        w.astype(jnp.float32),
        cls_score[0].astype(jnp.float32),
        target.astype(jnp.int32),
    )


def dos_loss_ref(deep_feats, cls_score, target, n, w):
    """Pure-JAX reference mirroring the PyTorch forward (hot path)."""
    d = deep_feats[0]
    norm = jnp.sqrt(jnp.sum((d[None, :] - n) ** 2, axis=1))        # (K,)
    logits = cls_score[0]                                          # (K, C)
    lse = jax.scipy.special.logsumexp(logits, axis=1)              # (K,)
    ce = lse - logits[jnp.arange(logits.shape[0]), target[0]]      # (K,)
    f_loss = jnp.sum(w @ norm[:, None])
    e = jnp.exp(-w * norm[None, :])
    rho = e / jnp.sum(e, axis=1, keepdims=True)
    g_loss = jnp.sum(rho @ ce[:, None])
    return f_loss + g_loss


if __name__ == "__main__":
    B, F, K, C, R = 2, 32, 8, 16, 4
    key = jax.random.PRNGKey(0)
    k1, k2, k3, k4 = jax.random.split(key, 4)

    deep_feats = jax.random.normal(k1, (B, F), dtype=jnp.float32)
    cls_score = jax.random.normal(k2, (B, K, C), dtype=jnp.float32)
    n = jax.random.normal(k3, (K, F), dtype=jnp.float32)
    w = jax.random.uniform(k4, (R, K), dtype=jnp.float32)
    target = jnp.array([3], dtype=jnp.int32)

    loss = dos_loss(deep_feats, cls_score, target, n, w)
    jax.block_until_ready(loss)

    ref = dos_loss_ref(deep_feats, cls_score, target, n, w)
    # Tolerance relaxed to 1e-3 because rho uses the EUP approximate reciprocal.
    assert jnp.allclose(loss, ref, rtol=1e-3, atol=1e-3), (loss, ref)

    print("KERNEL_OK")
</pallas_src>

<mosaic_0001>
module attributes {stable_mosaic.version = 11 : i64} {
  func.func @_dos_loss_kernel(%arg0: memref<1xi32, #tpu.memory_space<smem>>, %arg1: memref<9x32xf32, #tpu.memory_space<vmem>>, %arg2: memref<8x4xf32, #tpu.memory_space<vmem>>, %arg3: memref<8x16xf32, #tpu.memory_space<vmem>>, %arg4: memref<1x1xf32, #tpu.memory_space<vmem>>) attributes {dimension_semantics = [], scalar_prefetch = 0 : i64, scratch_operands = 0 : i64, tpu.core_type = #tpu.core_type<tc>} {
    %c0 = arith.constant 0 : index
    %c0_0 = arith.constant 0 : index
    %0 = vector.load %arg1[%c0, %c0_0] : memref<9x32xf32, #tpu.memory_space<vmem>>, vector<9x32xf32>
    %1 = vector.extract_strided_slice %0 {offsets = [0, 0], sizes = [8, 32], strides = [1, 1]} : vector<9x32xf32> to vector<8x32xf32>
    %2 = vector.extract_strided_slice %0 {offsets = [8, 0], sizes = [1, 32], strides = [1, 1]} : vector<9x32xf32> to vector<1x32xf32>
    %c0_1 = arith.constant 0 : index
    %c0_2 = arith.constant 0 : index
    %3 = vector.load %arg2[%c0_1, %c0_2] : memref<8x4xf32, #tpu.memory_space<vmem>>, vector<8x4xf32>
    %c0_3 = arith.constant 0 : index
    %c0_4 = arith.constant 0 : index
    %4 = vector.load %arg3[%c0_3, %c0_4] : memref<8x16xf32, #tpu.memory_space<vmem>>, vector<8x16xf32>
    %c0_5 = arith.constant 0 : index
    %5 = memref.load %arg0[%c0_5] : memref<1xi32, #tpu.memory_space<smem>>
    %6 = vector.broadcast %2 : vector<1x32xf32> to vector<8x32xf32>
    %7 = arith.subf %1, %6 : vector<8x32xf32>
    %8 = arith.mulf %7, %7 : vector<8x32xf32>
    %cst = arith.constant dense<0.000000e+00> : vector<8xf32>
    %9 = vector.multi_reduction <add>, %8, %cst [1] : vector<8x32xf32> to vector<8xf32>
    %10 = vector.shape_cast %9 : vector<8xf32> to vector<8x1xf32>
    %11 = math.sqrt %10 : vector<8x1xf32>
    %12 = vector.broadcast %11 : vector<8x1xf32> to vector<8x4xf32>
    %13 = arith.mulf %3, %12 : vector<8x4xf32>
    %14 = vector.shape_cast %13 : vector<8x4xf32> to vector<1x8x4xf32>
    %cst_6 = arith.constant dense<0.000000e+00> : vector<1xf32>
    %15 = vector.multi_reduction <add>, %14, %cst_6 [1, 2] : vector<1x8x4xf32> to vector<1xf32>
    %16 = vector.shape_cast %15 : vector<1xf32> to vector<1x1x1xf32>
    %17 = vector.extract %16[0, 0, 0] : f32 from vector<1x1x1xf32>
    %18 = vector.broadcast %17 : f32 to vector<1x1xf32>
    %cst_7 = arith.constant dense<0xFF800000> : vector<8xf32>
    %19 = vector.multi_reduction <maximumf>, %4, %cst_7 [1] : vector<8x16xf32> to vector<8xf32>
    %20 = vector.shape_cast %19 : vector<8xf32> to vector<8x1xf32>
    %21 = vector.broadcast %20 : vector<8x1xf32> to vector<8x16xf32>
    %22 = arith.subf %4, %21 : vector<8x16xf32>
    %23 = math.exp %22 : vector<8x16xf32>
    %cst_8 = arith.constant dense<0.000000e+00> : vector<8xf32>
    %24 = vector.multi_reduction <add>, %23, %cst_8 [1] : vector<8x16xf32> to vector<8xf32>
    %25 = vector.shape_cast %24 : vector<8xf32> to vector<8x1xf32>
    %26 = math.log %25 : vector<8x1xf32>
    %27 = arith.addf %20, %26 : vector<8x1xf32>
    %28 = tpu.iota {dimensions = array<i32: 1>} : vector<8x16xi32>
    %29 = vector.broadcast %5 : i32 to vector<8x16xi32>
    %30 = arith.cmpi eq, %28, %29 : vector<8x16xi32>
    %cst_9 = arith.constant 0.000000e+00 : f32
    %31 = vector.broadcast %cst_9 : f32 to vector<8x16xf32>
    %32 = arith.select %30, %4, %31 : vector<8x16xi1>, vector<8x16xf32>
    %cst_10 = arith.constant dense<0.000000e+00> : vector<8xf32>
    %33 = vector.multi_reduction <add>, %32, %cst_10 [1] : vector<8x16xf32> to vector<8xf32>
    %34 = vector.shape_cast %33 : vector<8xf32> to vector<8x1xf32>
    %35 = arith.subf %27, %34 : vector<8x1xf32>
    %cst_11 = arith.constant 0.000000e+00 : f32
    %36 = vector.broadcast %cst_11 : f32 to vector<8x4xf32>
    %37 = arith.subf %36, %3 : vector<8x4xf32>
    %38 = vector.broadcast %11 : vector<8x1xf32> to vector<8x4xf32>
    %39 = arith.mulf %37, %38 : vector<8x4xf32>
    %40 = math.exp %39 : vector<8x4xf32>
    %cst_12 = arith.constant dense<0.000000e+00> : vector<4xf32>
    %41 = vector.multi_reduction <add>, %40, %cst_12 [0] : vector<8x4xf32> to vector<4xf32>
    %42 = vector.shape_cast %41 : vector<4xf32> to vector<1x4xf32>
    %43 = tpu.reciprocal %42 {approx = true} : vector<1x4xf32> -> vector<1x4xf32>
    %44 = vector.broadcast %43 : vector<1x4xf32> to vector<8x4xf32>
    %45 = arith.mulf %40, %44 : vector<8x4xf32>
    %46 = vector.broadcast %35 : vector<8x1xf32> to vector<8x4xf32>
    %47 = arith.mulf %45, %46 : vector<8x4xf32>
    %48 = vector.shape_cast %47 : vector<8x4xf32> to vector<1x8x4xf32>
    %cst_13 = arith.constant dense<0.000000e+00> : vector<1xf32>
    %49 = vector.multi_reduction <add>, %48, %cst_13 [1, 2] : vector<1x8x4xf32> to vector<1xf32>
    %50 = vector.shape_cast %49 : vector<1xf32> to vector<1x1x1xf32>
    %51 = vector.extract %50[0, 0, 0] : f32 from vector<1x1x1xf32>
    %52 = vector.broadcast %51 : f32 to vector<1x1xf32>
    %53 = arith.addf %18, %52 : vector<1x1xf32>
    %c0_14 = arith.constant 0 : index
    %c0_15 = arith.constant 0 : index
    %54 = vector.load %arg4[%c0_14, %c0_15] : memref<1x1xf32, #tpu.memory_space<vmem>>, vector<1x1xf32>
    tpu.vector_store %arg4[%c0_14, %c0_15], %53 {strides = array<i32>} : memref<1x1xf32, #tpu.memory_space<vmem>>, vector<1x1xf32>,
    return
  }
}

</mosaic_0001>

<bundles_post_ra>
// kernel: _dos_loss_pallas.1
= control target key start
LH: loop header
LB: loop body
LE: loop exit
PB: predicated region body
PF: predicated region fallthrough
CT: control target
= control target key end

     0   :  { %vm54_vm0 = vcmask 130048   ;;  %s217_s0 = inlined_call_operand.<no memory space> [shape: s32[1], index: 0, kind: input, shape index: {}]   ;;  %s218_s1 = inlined_call_operand.vmem [shape: f32[9,32], index: 1, kind: input, shape index: {}]   ;;  %s219_s2 = inlined_call_operand.vmem [shape: f32[8,4], index: 2, kind: input, shape index: {}]   ;;  %s220_s3 = inlined_call_operand.vmem [shape: f32[8,16], index: 3, kind: input, shape index: {}]   ;;  %s221_s4 = inlined_call_operand.hbm [shape: f32[1,1], index: 4, kind: output, shape index: {}]  }
   0x1   :  { %v22_v0 = vld [vmem:[%s220_s3] sm:$0xff]  ;;  %v118_v2 = vld [vmem:[%s218_s1 + $0x8] ss:$0 sm:$0xff] }
   0x2   :  { %v19_v1 = vld [vmem:[%s218_s1] sm:$0xff]  ;;  %v55_v3 = vsel %vm54_vm0, %v22_v0, -inf }
   0x3   :  { %v28_v4 = vsub.f32 %v19_v1, %v118_v2 }
   0x4   :  { %10 = vsyncpa [#allocation4], 0  ;;  %56 = vmax.xlane.f32.xlu0 %v55_v3  ;;  %vm30_vm1 = vcmask 261120   ;;  %v67_v10 = vlaneseq  ;;  %v69_v13 = vstv %s217_s0  ;;  %v21_v22 = vld [vmem:[%s219_s2] sm:$0xff]  ;;  %vm42_vm5 = vcmask 31744   ;;  %s158_s2 = smov [#allocation3]  }
   0x5   :  { %v29_v5 = vmul.f32 %v28_v4, %v28_v4  ;;  %v76_v26 = vsub.f32 0.0, %v21_v22  ;;  %s110_s23 = sshll.u32 %s158_s2, 4  ;;  %vm102_vm6 = vcmask 0   ;;  %s111_s23 = int_to_ptr.vmem [resolvable:$true] %s110_s23 }
   0x6   :  { %v68_v12 = vand.u32 127, %v67_v10  ;;  %s134_s25 = scalar_lea.vmem %s111_s23, 16  ;;  %s138_s26 = scalar_lea.vmem %s111_s23, 32 }
   0x7   :  { %v31_v6 = vsel %vm30_vm1, %v29_v5, 0.0  ;;  %p135_p0 = scmp.ne.s32.totalorder %s111_s23, %s134_s25  ;;  %p139_p1 = scmp.lt.s32.totalorder %s111_s23, %s111_s23 }
   0x8   :  { %32 = vadd.xlane.f32.xlu0 %v31_v6  ;;  %vm70_vm2 = vcmp.eq.s32.totalorder %v68_v12, %v69_v13  ;;  %p140_p2 = scmp.lt.s32.totalorder %s138_s26, %s134_s25 }
   0x9   :  { %v71_v15 = vsel %vm70_vm2, %v22_v0, 0.0 }
   0xa   :  { %v72_v20 = vsel %vm54_vm0, %v71_v15, 0.0  ;;  %p141_p3 = por %p140_p2, %p139_p1 }
   0xc   :  { %p142_p4 = pnand %p141_p3, %p135_p0 }
  0x91   :  { %v57_v7 = vpop.xlane.xlu0 %56 }
  0x92   :  { %v58_v8 = vsub.f32 %v22_v0, %v57_v7 }
  0x94   :  { %v59_v9 = vmul.f32 1.442695, %v58_v8 }
  0x95   :  { %v33_v11 = vpop.xlane.xlu0 %32 }
  0x96   :  { %124 = vpow2.f32 %v59_v9  ;;  %vm36_vm3 = vcmp.eq.f32.partialorder %v33_v11, inf  ;;  %v39_v18 = vand.u32 2147483648, %v33_v11  ;;  %vm38_vm4 = vcmp.eq.f32.partialorder %v33_v11, 0.0 }
  0x97   :  { %126 = vrsqrt.f32 %v33_v11 }
  0xa0   :  { %v125_v14 = vpop.eup %124 }
  0xa1   :  { %v127_v16 = vpop.eup %126  ;;  %v61_v17 = vsel %vm54_vm0, %v125_v14, 0.0 }
  0xa2   :  { %62 = vadd.xlane.f32.xlu1 %v61_v17  ;;  %v35_v19 = vmul.f32 %v127_v16, %v33_v11 }
  0xa4   :  { %v37_v21 = vsel %vm36_vm3, %v33_v11, %v35_v19 }
  0xa5   :  { %v40_v23 = vsel %vm38_vm4, %v39_v18, %v37_v21 }
  0xa6   :  { %73 = vadd.xlane.f32.xlu1 %v72_v20  ;;  %v41_v24 = vmul.f32 %v40_v23, %v21_v22  ;;  %v77_v27 = vmul.f32 %v76_v26, %v40_v23 }
  0xa8   :  { %v43_v25 = vsel %vm42_vm5, %v41_v24, 0.0  ;;  %v78_v28 = vmul.f32 1.442695, %v77_v27 }
  0xa9   :  { %44 = vadd.xlane.f32.xlu0 %v43_v25 }
  0xaa   :  { %128 = vpow2.f32 %v78_v28 }
  0xb4   :  { %v129_v29 = vpop.eup %128 }
  0xb5   :  { %v80_v30 = vsel %vm42_vm5, %v129_v29, 0.0 }
  0xb6   :  { %v81_v31 = vrot.slane %v80_v30, 4 }
  0xb8   :  { %v82_v32 = vadd.f32 %v81_v31, %v80_v30 }
  0xba   :  { %v83_v33 = vrot.slane %v82_v32, 2 }
  0xbc   :  { %v84_v34 = vadd.f32 %v83_v33, %v82_v32 }
  0xbe   :  { %v85_v35 = vrot.slane %v84_v34, 1 }
  0xc0   :  { %v86_v36 = vadd.f32 %v85_v35, %v84_v34 }
 0x12f   :  { %v63_v37 = vpop.xlane.xlu1 %62 }
 0x130   :  { %130 = vlog2.f32 %v63_v37 }
 0x131   :  { %132 = vrcp.f32 %v86_v36 }
 0x133   :  { %v74_v45 = vpop.xlane.xlu1 %73 }
 0x136   :  { %v45_v38 = vpop.xlane.xlu0 %44 }
 0x137   :  { %v46_v39 = vrot.slane %v45_v38, 4 }
 0x139   :  { %v47_v40 = vadd.f32 %v46_v39, %v45_v38 }
 0x13a   :  { %v131_v41 = vpop.eup %130 }
 0x13b   :  { %v65_v42 = vmul.f32 0.6931472, %v131_v41  ;;  %v48_v43 = vrot.slane %v47_v40, 2  ;;  %v133_v44 = vpop.eup %132 }
 0x13c   :  { %v88_v49 = vmul.f32 %v133_v44, %v129_v29 }
 0x13d   :  { %v66_v46 = vadd.f32 %v65_v42, %v57_v7  ;;  %v49_v47 = vadd.f32 %v48_v43, %v47_v40 }
 0x13f   :  { %v75_v48 = vsub.f32 %v66_v46, %v74_v45  ;;  %v50_v50 = vrot.slane %v49_v47, 1 }
 0x141   :  { %v89_v51 = vmul.f32 %v88_v49, %v75_v48  ;;  %v51_v52 = vadd.f32 %v50_v50, %v49_v47 }
 0x143   :  { %v90_v53 = vsel %vm42_vm5, %v89_v51, 0.0  ;;  %119 = vpush %v51_v52 }
 0x144   :  { %91 = vadd.xlane.f32.xlu1 %v90_v53 }
 0x174   :  { %s120_s0 = spop %119 }
 0x175   :  { %v53_v61 = vstv %s120_s0 }
 0x1d1   :  { %v92_v54 = vpop.xlane.xlu1 %91 }
 0x1d2   :  { %v93_v55 = vrot.slane %v92_v54, 4 }
 0x1d4   :  { %v94_v56 = vadd.f32 %v93_v55, %v92_v54 }
 0x1d6   :  { %v95_v57 = vrot.slane %v94_v56, 2 }
 0x1d8   :  { %v96_v58 = vadd.f32 %v95_v57, %v94_v56 }
 0x1da   :  { %v97_v59 = vrot.slane %v96_v58, 1 }
 0x1dc   :  { %v98_v60 = vadd.f32 %v97_v59, %v96_v58 }
 0x1de   :  { %121 = vpush %v98_v60 }
 0x20f   :  { %s122_s24 = spop %121 }
 0x210   :  { %v100_v62 = vstv %s122_s24 }
 0x211   :  { %v101_v63 = vadd.f32 %v100_v62, %v53_v61 }
 0x213   :  { %103 = vst.msk [vmem:[#allocation3] sm:$0x1] %vm102_vm6, %v101_v63 }
 0x214   :  { %145 = shalt.err (!%p142_p4)
}
 0x215   :  { %s146_s29 = scalar_lea.hbm %s221_s4, 16 }
 0x216   :  { %p147_p5 = scmp.ne.s32.totalorder %s221_s4, %s146_s29  ;;  %p150_p6 = scmp.lt.u32.totalorder %s146_s29, %s221_s4 }
 0x218   :  { %p152_p7 = pnand %p150_p6, %p147_p5 }
 0x21a   :  { %155 = shalt.err (!%p152_p7)
}
 0x21b   :  { %113 = dma.vmem_to_hbm [thread:$0]  %s111_s23, 16, %s221_s4, [#allocation4]  }
 0x21c   :  { %156 = dma.done.wait [#allocation4], 16  }
 0x21d   :  { %157 = vsyncadd [#allocation4], 4294967280 }
 0x21e   :  { %117 = vsyncpa [#allocation4], 1 }

</bundles_post_ra>
